<compile_context>
chip_gen: v7x
topology: tpu7x:2x2x1
jax: 0.10.0
libtpu: 0.0.40
codegen_flags: <defaults>
</compile_context>

<pallas_src>
import functools
import math

import jax
import jax.numpy as jnp
from jax import lax
from jax.experimental import pallas as pl
from jax.experimental.pallas import tpu as pltpu

# ---- module hyperparameters (consistent with AttentionPool.__init__) ----
DIM = 32
NUM_HEADS = 4
HEAD_DIM = DIM // NUM_HEADS          # 8
MLP_RATIO = 4
HIDDEN = int(DIM * MLP_RATIO)        # 128
NORM_EPS = 1e-5
# weight slab layout: [Ws | Wv | Wp | 0-pad | W1]  (W1 lane-aligned at 128)
WSLAB_COLS = 4 * DIM + HIDDEN        # 256
# activation='gelu' (default) -> exact erf GELU; proj_dropout=0.0 / eval -> no-op.

B = 2
L = 8


def attention_pool_kernel(x_ref, w_ref, w2_ref, b_ref, o_ref, *, batch, seq):
    C = DIM
    R = batch * seq
    f32 = jnp.float32

    # ---- unpack lane-dense parameter slabs (static slices, done once) ----
    bsv   = b_ref[0:1, 0:2 * C]               # (1, 2C)  [bs | bv]
    bp    = b_ref[0:1, 2 * C:3 * C]           # (1, C)
    b2    = b_ref[0:1, 3 * C:4 * C]           # (1, C)
    gamma = b_ref[1:2, 0:C]                   # (1, C)
    beta  = b_ref[1:2, C:2 * C]               # (1, C)
    b1    = b_ref[2:3, 0:HIDDEN]              # (1, HIDDEN)
    seg_t = b_ref[3:3 + batch, 0:R]           # (batch, R) precomputed segment mask

    wsv = w_ref[:, 0:2 * C]                   # (C, 2C)  [Ws | Wv]
    wp  = w_ref[:, 2 * C:3 * C]               # (C, C)
    w1  = w_ref[:, 4 * C:4 * C + HIDDEN]      # (C, HIDDEN)

    x2 = x_ref[...]                           # (R, C): whole batch, rows = (b, l)

    # One matmul gives both the per-head scores (already broadcast to every
    # channel of the head — q, 1/sqrt(d), head mask and Wk were folded into
    # Ws on the host) and the value projection.
    sv = jnp.dot(x2, wsv, preferred_element_type=f32) + bsv          # (R, 2C)
    s = sv[:, :C]                                                    # (R, C) scores
    v = sv[:, C:2 * C]                                               # (R, C) values

    # Softmax over the L axis with a per-batch max (batch/seq are static, so
    # these are static sublane-aligned row-block slices; XLU/VPU slack).
    p_blocks = []
    for bi in range(batch):
        sb = s[bi * seq:(bi + 1) * seq, :]                           # (seq, C)
        mb = jnp.max(sb, axis=0, keepdims=True)                      # (1, C)
        p_blocks.append(jnp.exp(sb - mb))
    p = jnp.concatenate(p_blocks, axis=0)                            # (R, C)

    # Numerator and denominator reduced with ONE batch-segment matmul.
    pv_p = jnp.concatenate([p * v, p], axis=1)                       # (R, 2C)
    nd = jnp.dot(seg_t, pv_p, preferred_element_type=f32)            # (batch, 2C)
    attn = nd[:, :C] / nd[:, C:2 * C]                                # (batch, C)

    # x = proj(attn)   (dropout is identity: proj_dropout=0.0 / inference)
    y = jnp.dot(attn, wp, preferred_element_type=f32) + bp           # (batch, C)

    # LayerNorm in float32 (LayerNorm subclass casts to float; already f32)
    mu = jnp.mean(y, axis=-1, keepdims=True)
    var = jnp.mean((y - mu) ** 2, axis=-1, keepdims=True)
    xn = (y - mu) * lax.rsqrt(var + NORM_EPS) * gamma + beta

    # MLP: Linear -> exact GELU -> Linear (dropout is identity)
    h1 = jnp.dot(xn, w1, preferred_element_type=f32) + b1            # (batch, HIDDEN)
    h1 = 0.5 * h1 * (1.0 + lax.erf(h1 / math.sqrt(2.0)))
    h2 = jnp.dot(h1, w2_ref[...], preferred_element_type=f32) + b2   # (batch, C)

    # residual; the module returns x[:, 0] -> one (C,) row per batch element
    o_ref[...] = y + h2


def pack_params(params, batch, seq):
    """Fold q/scale/head-mask/Wk into Ws and pack everything into 3 slabs."""
    (cls, wq_t, bq, wkv_t, bkv, wp_t, bp, gamma, beta, w1_t, b1, w2_t, b2) = params
    C, D, R = DIM, HEAD_DIM, batch * seq
    hi = lax.Precision.HIGHEST

    wk_t, wv_t = wkv_t[:, :C], wkv_t[:, C:]
    bk, bv = bkv[:, :C], bkv[:, C:]

    # Wscore[c, c'] = (1/sqrt(d)) * q[c] * 1[head(c)==head(c')]
    q_scaled = (jnp.dot(cls, wq_t, precision=hi) + bq) * (1.0 / math.sqrt(D))  # (1, C)
    head = jnp.arange(C) // D
    mm = (head[:, None] == head[None, :]).astype(jnp.float32)                  # (C, C)
    wscore = q_scaled.reshape(C, 1) * mm                                       # (C, C)
    ws = jnp.dot(wk_t, wscore, precision=hi)                                   # (C, C)
    bs = jnp.dot(bk, wscore, precision=hi)                                     # (1, C)

    # weight slab (C, 256): [Ws | Wv | Wp | 0-pad | W1] (W1 lane-aligned at 128)
    wslab = jnp.concatenate(
        [ws, wv_t, wp_t, jnp.zeros((C, C), jnp.float32), w1_t], axis=1)

    # bias slab: biases / LN affine / b1 / precomputed batch-segment mask
    rows = max(8, 3 + batch)
    cols = max(HIDDEN, R)
    assert 4 * C <= cols
    bslab = jnp.zeros((rows, cols), jnp.float32)
    bslab = bslab.at[0, 0 * C:1 * C].set(bs[0])
    bslab = bslab.at[0, 1 * C:2 * C].set(bv[0])
    bslab = bslab.at[0, 2 * C:3 * C].set(bp[0])
    bslab = bslab.at[0, 3 * C:4 * C].set(b2[0])
    bslab = bslab.at[1, 0:C].set(gamma[0])
    bslab = bslab.at[1, C:2 * C].set(beta[0])
    bslab = bslab.at[2, 0:HIDDEN].set(b1[0])
    seg = (jnp.arange(R) // seq == jnp.arange(batch)[:, None]).astype(jnp.float32)
    bslab = bslab.at[3:3 + batch, 0:R].set(seg)

    # TODO(synk): low priority — fold W2^T into the weight slab (one fewer DMA)
    #   only if a trace shows the DMA saving beats the possible XLU transpose.
    return wslab, w2_t, bslab


def attention_pool(x, params):
    b, s, c = x.shape
    assert c == DIM
    wslab, w2_t, bslab = pack_params(params, b, s)
    x2d = x.reshape(b * s, c)    # one lane-dense input slab, one DMA

    kernel = functools.partial(attention_pool_kernel, batch=b, seq=s)
    out = pl.pallas_call(
        kernel,
        out_shape=jax.ShapeDtypeStruct((b, c), jnp.float32),
        grid=(1,),                                            # single step: whole batch
        in_specs=[
            pl.BlockSpec((b * s, c), lambda i: (0, 0)),       # x (flattened)
            pl.BlockSpec(wslab.shape, lambda i: (0, 0)),      # [Ws|Wv|Wp|pad|W1]
            pl.BlockSpec(w2_t.shape, lambda i: (0, 0)),       # W2
            pl.BlockSpec(bslab.shape, lambda i: (0, 0)),      # biases/LN/seg mask
        ],
        out_specs=pl.BlockSpec((b, c), lambda i: (0, 0)),
        compiler_params=pltpu.CompilerParams(dimension_semantics=("arbitrary",)),
    )(x2d, wslab, w2_t, bslab)
    return out                                                 # (B, C)


def reference(x, params):
    """Pure-JAX reference of the PyTorch forward (for correctness check)."""
    (cls, wq_t, bq, wkv_t, bkv, wp_t, bp, gamma, beta, w1_t, b1, w2_t, b2) = params
    b, s, c = x.shape
    hi = lax.Precision.HIGHEST
    q = jnp.dot(cls, wq_t, precision=hi) + bq                 # (1, C)
    kv = jnp.dot(x, wkv_t, precision=hi) + bkv                # (B, L, 2C)
    k, v = kv[..., :DIM], kv[..., DIM:]
    qh = q.reshape(1, NUM_HEADS, HEAD_DIM)
    kh = k.reshape(b, s, NUM_HEADS, HEAD_DIM)
    vh = v.reshape(b, s, NUM_HEADS, HEAD_DIM)
    scores = jnp.einsum("qhd,bshd->bhqs", qh, kh, precision=hi) / math.sqrt(HEAD_DIM)
    p = jax.nn.softmax(scores, axis=-1)
    o = jnp.einsum("bhqs,bshd->bqhd", p, vh, precision=hi).reshape(b, 1, c)
    y = jnp.dot(o, wp_t, precision=hi) + bp
    mu = jnp.mean(y, axis=-1, keepdims=True)
    var = jnp.mean((y - mu) ** 2, axis=-1, keepdims=True)
    xn = (y - mu) / jnp.sqrt(var + NORM_EPS) * gamma + beta
    h1 = jnp.dot(xn, w1_t, precision=hi) + b1
    h1 = 0.5 * h1 * (1.0 + lax.erf(h1 / math.sqrt(2.0)))
    h2 = jnp.dot(h1, w2_t, precision=hi) + b2
    return (y + h2)[:, 0]


def make_params(key):
    gain = 1.0 / math.sqrt(DIM)
    ks = jax.random.split(key, 13)
    nrm = lambda k, shp, sc=0.05: (sc * jax.random.normal(k, shp)).astype(jnp.float32)
    cls = gain * jax.random.normal(ks[0], (1, DIM), dtype=jnp.float32)   # (1,1,dim) squeezed
    wq_t = nrm(ks[1], (DIM, DIM));          bq = nrm(ks[2], (1, DIM))
    wkv_t = nrm(ks[3], (DIM, 2 * DIM));     bkv = nrm(ks[4], (1, 2 * DIM))
    wp_t = nrm(ks[5], (DIM, DIM));          bp = nrm(ks[6], (1, DIM))
    gamma = jnp.ones((1, DIM), jnp.float32); beta = jnp.zeros((1, DIM), jnp.float32)
    w1_t = nrm(ks[7], (DIM, HIDDEN));       b1 = nrm(ks[8], (1, HIDDEN))
    w2_t = nrm(ks[9], (HIDDEN, DIM));       b2 = nrm(ks[10], (1, DIM))
    return (cls, wq_t, bq, wkv_t, bkv, wp_t, bp, gamma, beta, w1_t, b1, w2_t, b2)


if __name__ == "__main__":
    key = jax.random.PRNGKey(0)
    kx, kp = jax.random.split(key)
    x = jax.random.normal(kx, (B, L, DIM), dtype=jnp.float32)
    params = make_params(kp)

    out = attention_pool(x, params)
    out = jax.block_until_ready(out)

    ref = reference(x, params)
    assert out.shape == (B, DIM)
    # exact divide for the softmax normalization + f32 MXU operands ->
    # tight tolerance restored (only f32 re-association differences remain).
    assert jnp.allclose(out, ref, atol=2e-4, rtol=2e-4), float(jnp.abs(out - ref).max())
    print("KERNEL_OK")
</pallas_src>

<mosaic_0001>
module attributes {stable_mosaic.version = 11 : i64} {
  func.func @attention_pool_kernel(%arg0: i32, %arg1: memref<16x32xf32, #tpu.memory_space<vmem>>, %arg2: memref<32x256xf32, #tpu.memory_space<vmem>>, %arg3: memref<128x32xf32, #tpu.memory_space<vmem>>, %arg4: memref<8x128xf32, #tpu.memory_space<vmem>>, %arg5: memref<2x32xf32, #tpu.memory_space<vmem>>) attributes {dimension_semantics = [#tpu.dimension_semantics<arbitrary>], iteration_bounds = array<i64: 1>, scalar_prefetch = 0 : i64, scratch_operands = 0 : i64, tpu.core_type = #tpu.core_type<tc>, window_params = [{pipeline_mode = #tpu.pipeline_mode<synchronous>, transform_indices = @transform_0, window_bounds = array<i64: 16, 32>}, {pipeline_mode = #tpu.pipeline_mode<synchronous>, transform_indices = @transform_1, window_bounds = array<i64: 32, 256>}, {pipeline_mode = #tpu.pipeline_mode<synchronous>, transform_indices = @transform_2, window_bounds = array<i64: 128, 32>}, {pipeline_mode = #tpu.pipeline_mode<synchronous>, transform_indices = @transform_3, window_bounds = array<i64: 8, 128>}, {pipeline_mode = #tpu.pipeline_mode<synchronous>, transform_indices = @transform_4, window_bounds = array<i64: 2, 32>}]} {
    %c0 = arith.constant 0 : index
    %c0_0 = arith.constant 0 : index
    %0 = vector.load %arg4[%c0, %c0_0] : memref<8x128xf32, #tpu.memory_space<vmem>>, vector<1x64xf32>
    %c0_1 = arith.constant 0 : index
    %c64 = arith.constant 64 : index
    %1 = vector.load %arg4[%c0_1, %c64] : memref<8x128xf32, #tpu.memory_space<vmem>>, vector<1x32xf32>
    %c0_2 = arith.constant 0 : index
    %c96 = arith.constant 96 : index
    %2 = vector.load %arg4[%c0_2, %c96] : memref<8x128xf32, #tpu.memory_space<vmem>>, vector<1x32xf32>
    %c1 = arith.constant 1 : index
    %c0_3 = arith.constant 0 : index
    %3 = vector.load %arg4[%c1, %c0_3] : memref<8x128xf32, #tpu.memory_space<vmem>>, vector<1x32xf32>
    %c1_4 = arith.constant 1 : index
    %c32 = arith.constant 32 : index
    %4 = vector.load %arg4[%c1_4, %c32] : memref<8x128xf32, #tpu.memory_space<vmem>>, vector<1x32xf32>
    %c2 = arith.constant 2 : index
    %c0_5 = arith.constant 0 : index
    %5 = vector.load %arg4[%c2, %c0_5] : memref<8x128xf32, #tpu.memory_space<vmem>>, vector<1x128xf32>
    %c3 = arith.constant 3 : index
    %c0_6 = arith.constant 0 : index
    %6 = vector.load %arg4[%c3, %c0_6] : memref<8x128xf32, #tpu.memory_space<vmem>>, vector<2x16xf32>
    %c0_7 = arith.constant 0 : index
    %c0_8 = arith.constant 0 : index
    %7 = vector.load %arg2[%c0_7, %c0_8] : memref<32x256xf32, #tpu.memory_space<vmem>>, vector<32x64xf32>
    %c0_9 = arith.constant 0 : index
    %c64_10 = arith.constant 64 : index
    %8 = vector.load %arg2[%c0_9, %c64_10] : memref<32x256xf32, #tpu.memory_space<vmem>>, vector<32x32xf32>
    %c0_11 = arith.constant 0 : index
    %c128 = arith.constant 128 : index
    %9 = vector.load %arg2[%c0_11, %c128] : memref<32x256xf32, #tpu.memory_space<vmem>>, vector<32x128xf32>
    %c0_12 = arith.constant 0 : index
    %c0_13 = arith.constant 0 : index
    %10 = vector.load %arg1[%c0_12, %c0_13] : memref<16x32xf32, #tpu.memory_space<vmem>>, vector<16x32xf32>
    %cst = arith.constant dense<0.000000e+00> : vector<16x64xf32>
    %11 = tpu.matmul %10, %7, %cst {dimension_numbers = #tpu.dot_dimension_numbers<[1], [0], [0], [1], [0, 0, 1, 1], [], []>} : vector<16x32xf32>, vector<32x64xf32>, vector<16x64xf32> -> vector<16x64xf32>
    %12 = vector.broadcast %0 : vector<1x64xf32> to vector<16x64xf32>
    %13 = arith.addf %11, %12 : vector<16x64xf32>
    %14 = vector.extract_strided_slice %13 {offsets = [0, 0], sizes = [16, 32], strides = [1, 1]} : vector<16x64xf32> to vector<16x32xf32>
    %15 = vector.extract_strided_slice %13 {offsets = [0, 32], sizes = [16, 32], strides = [1, 1]} : vector<16x64xf32> to vector<16x32xf32>
    %16 = vector.extract_strided_slice %14 {offsets = [0, 0], sizes = [8, 32], strides = [1, 1]} : vector<16x32xf32> to vector<8x32xf32>
    %cst_14 = arith.constant dense<0xFF800000> : vector<32xf32>
    %17 = vector.multi_reduction <maximumf>, %16, %cst_14 [0] : vector<8x32xf32> to vector<32xf32>
    %18 = vector.shape_cast %17 : vector<32xf32> to vector<1x32xf32>
    %19 = vector.broadcast %18 : vector<1x32xf32> to vector<8x32xf32>
    %20 = arith.subf %16, %19 : vector<8x32xf32>
    %21 = math.exp %20 : vector<8x32xf32>
    %22 = vector.extract_strided_slice %14 {offsets = [8, 0], sizes = [8, 32], strides = [1, 1]} : vector<16x32xf32> to vector<8x32xf32>
    %cst_15 = arith.constant dense<0xFF800000> : vector<32xf32>
    %23 = vector.multi_reduction <maximumf>, %22, %cst_15 [0] : vector<8x32xf32> to vector<32xf32>
    %24 = vector.shape_cast %23 : vector<32xf32> to vector<1x32xf32>
    %25 = vector.broadcast %24 : vector<1x32xf32> to vector<8x32xf32>
    %26 = arith.subf %22, %25 : vector<8x32xf32>
    %27 = math.exp %26 : vector<8x32xf32>
    %28 = tpu.concatenate %21, %27 in 0 : vector<8x32xf32>, vector<8x32xf32> -> vector<16x32xf32>
    %29 = arith.mulf %28, %15 : vector<16x32xf32>
    %30 = tpu.concatenate %29, %28 in 1 : vector<16x32xf32>, vector<16x32xf32> -> vector<16x64xf32>
    %cst_16 = arith.constant dense<0.000000e+00> : vector<2x64xf32>
    %31 = tpu.matmul %6, %30, %cst_16 {dimension_numbers = #tpu.dot_dimension_numbers<[1], [0], [0], [1], [0, 0, 1, 1], [], []>} : vector<2x16xf32>, vector<16x64xf32>, vector<2x64xf32> -> vector<2x64xf32>
    %32 = vector.extract_strided_slice %31 {offsets = [0, 0], sizes = [2, 32], strides = [1, 1]} : vector<2x64xf32> to vector<2x32xf32>
    %33 = vector.extract_strided_slice %31 {offsets = [0, 32], sizes = [2, 32], strides = [1, 1]} : vector<2x64xf32> to vector<2x32xf32>
    %34 = arith.divf %32, %33 : vector<2x32xf32>
    %cst_17 = arith.constant dense<0.000000e+00> : vector<2x32xf32>
    %35 = tpu.matmul %34, %8, %cst_17 {dimension_numbers = #tpu.dot_dimension_numbers<[1], [0], [0], [1], [0, 0, 1, 1], [], []>} : vector<2x32xf32>, vector<32x32xf32>, vector<2x32xf32> -> vector<2x32xf32>
    %36 = vector.broadcast %1 : vector<1x32xf32> to vector<2x32xf32>
    %37 = arith.addf %35, %36 : vector<2x32xf32>
    %cst_18 = arith.constant dense<0.000000e+00> : vector<2xf32>
    %38 = vector.multi_reduction <add>, %37, %cst_18 [1] : vector<2x32xf32> to vector<2xf32>
    %39 = vector.shape_cast %38 : vector<2xf32> to vector<2x1xf32>
    %cst_19 = arith.constant 3.200000e+01 : f32
    %40 = vector.broadcast %cst_19 : f32 to vector<2x1xf32>
    %41 = arith.divf %39, %40 : vector<2x1xf32>
    %42 = vector.broadcast %41 : vector<2x1xf32> to vector<2x32xf32>
    %43 = arith.subf %37, %42 : vector<2x32xf32>
    %44 = arith.mulf %43, %43 : vector<2x32xf32>
    %cst_20 = arith.constant dense<0.000000e+00> : vector<2xf32>
    %45 = vector.multi_reduction <add>, %44, %cst_20 [1] : vector<2x32xf32> to vector<2xf32>
    %46 = vector.shape_cast %45 : vector<2xf32> to vector<2x1xf32>
    %cst_21 = arith.constant 3.200000e+01 : f32
    %47 = vector.broadcast %cst_21 : f32 to vector<2x1xf32>
    %48 = arith.divf %46, %47 : vector<2x1xf32>
    %49 = vector.broadcast %41 : vector<2x1xf32> to vector<2x32xf32>
    %50 = arith.subf %37, %49 : vector<2x32xf32>
    %cst_22 = arith.constant 9.99999974E-6 : f32
    %51 = vector.broadcast %cst_22 : f32 to vector<2x1xf32>
    %52 = arith.addf %48, %51 : vector<2x1xf32>
    %53 = math.rsqrt %52 : vector<2x1xf32>
    %54 = vector.broadcast %53 : vector<2x1xf32> to vector<2x32xf32>
    %55 = arith.mulf %50, %54 : vector<2x32xf32>
    %56 = vector.broadcast %3 : vector<1x32xf32> to vector<2x32xf32>
    %57 = arith.mulf %55, %56 : vector<2x32xf32>
    %58 = vector.broadcast %4 : vector<1x32xf32> to vector<2x32xf32>
    %59 = arith.addf %57, %58 : vector<2x32xf32>
    %cst_23 = arith.constant dense<0.000000e+00> : vector<2x128xf32>
    %60 = tpu.matmul %59, %9, %cst_23 {dimension_numbers = #tpu.dot_dimension_numbers<[1], [0], [0], [1], [0, 0, 1, 1], [], []>} : vector<2x32xf32>, vector<32x128xf32>, vector<2x128xf32> -> vector<2x128xf32>
    %61 = vector.broadcast %5 : vector<1x128xf32> to vector<2x128xf32>
    %62 = arith.addf %60, %61 : vector<2x128xf32>
    %cst_24 = arith.constant 5.000000e-01 : f32
    %63 = vector.broadcast %cst_24 : f32 to vector<2x128xf32>
    %64 = arith.mulf %63, %62 : vector<2x128xf32>
    %cst_25 = arith.constant 1.41421354 : f32
    %65 = vector.broadcast %cst_25 : f32 to vector<2x128xf32>
    %66 = arith.divf %62, %65 : vector<2x128xf32>
    %67 = math.erf %66 : vector<2x128xf32>
    %cst_26 = arith.constant 1.000000e+00 : f32
    %68 = vector.broadcast %cst_26 : f32 to vector<2x128xf32>
    %69 = arith.addf %68, %67 : vector<2x128xf32>
    %70 = arith.mulf %64, %69 : vector<2x128xf32>
    %c0_27 = arith.constant 0 : index
    %c0_28 = arith.constant 0 : index
    %71 = vector.load %arg3[%c0_27, %c0_28] : memref<128x32xf32, #tpu.memory_space<vmem>>, vector<128x32xf32>
    %cst_29 = arith.constant dense<0.000000e+00> : vector<2x32xf32>
    %72 = tpu.matmul %70, %71, %cst_29 {dimension_numbers = #tpu.dot_dimension_numbers<[1], [0], [0], [1], [0, 0, 1, 1], [], []>} : vector<2x128xf32>, vector<128x32xf32>, vector<2x32xf32> -> vector<2x32xf32>
    %73 = vector.broadcast %2 : vector<1x32xf32> to vector<2x32xf32>
    %74 = arith.addf %72, %73 : vector<2x32xf32>
    %75 = arith.addf %37, %74 : vector<2x32xf32>
    %c0_30 = arith.constant 0 : index
    %c0_31 = arith.constant 0 : index
    %76 = vector.load %arg5[%c0_30, %c0_31] : memref<2x32xf32, #tpu.memory_space<vmem>>, vector<2x32xf32>
    tpu.vector_store %arg5[%c0_30, %c0_31], %75 {strides = array<i32>} : memref<2x32xf32, #tpu.memory_space<vmem>>, vector<2x32xf32>,
    return
  }
  func.func @transform_0(%arg0: i32) -> (i32, i32) {
    %c0_i32 = arith.constant 0 : i32
    %c0_i32_0 = arith.constant 0 : i32
    %c0_i32_1 = arith.constant 0 : i32
    return %c0_i32, %c0_i32_0 : i32, i32
  }
  func.func @transform_1(%arg0: i32) -> (i32, i32) {
    %c0_i32 = arith.constant 0 : i32
    %c0_i32_0 = arith.constant 0 : i32
    %c0_i32_1 = arith.constant 0 : i32
    return %c0_i32, %c0_i32_0 : i32, i32
  }
  func.func @transform_2(%arg0: i32) -> (i32, i32) {
    %c0_i32 = arith.constant 0 : i32
    %c0_i32_0 = arith.constant 0 : i32
    %c0_i32_1 = arith.constant 0 : i32
    return %c0_i32, %c0_i32_0 : i32, i32
  }
  func.func @transform_3(%arg0: i32) -> (i32, i32) {
    %c0_i32 = arith.constant 0 : i32
    %c0_i32_0 = arith.constant 0 : i32
    %c0_i32_1 = arith.constant 0 : i32
    return %c0_i32, %c0_i32_0 : i32, i32
  }
  func.func @transform_4(%arg0: i32) -> (i32, i32) {
    %c0_i32 = arith.constant 0 : i32
    %c0_i32_0 = arith.constant 0 : i32
    %c0_i32_1 = arith.constant 0 : i32
    return %c0_i32, %c0_i32_0 : i32, i32
  }
}

</mosaic_0001>

<bundles_post_ra>
// kernel: tpu_custom_call.1
= control target key start
LH: loop header
LB: loop body
LE: loop exit
PB: predicated region body
PF: predicated region fallthrough
CT: control target
= control target key end

     0   :  { %vm36_vm0 = vcmask 261120   ;;  %s964_s0 = inlined_call_operand.vmem [shape: f32[16,32], index: 0, kind: input, shape index: {}]   ;;  %s965_s1 = inlined_call_operand.vmem [shape: f32[32,256], index: 1, kind: input, shape index: {}]   ;;  %s966_s2 = inlined_call_operand.vmem [shape: f32[128,32], index: 2, kind: input, shape index: {}]   ;;  %s967_s3 = inlined_call_operand.vmem [shape: f32[8,128], index: 3, kind: input, shape index: {}]   ;;  %s968_s4 = inlined_call_operand.hbm [shape: f32[2,32], index: 4, kind: output, shape index: {}]  }
   0x1   :  { %v801_v0 = vld [vmem:[%s965_s1] sm:$0xff]  ;;  %v806_v1 = vld [vmem:[%s965_s1 + $0x10] sm:$0xff] }
   0x2   :  { %v811_v2 = vld [vmem:[%s965_s1 + $0x20] sm:$0xff]  ;;  %v722_v3 = vpack.i.bf16 %v806_v1, %v801_v0  ;;  %v663_v4 = vpack.c.bf16 %v806_v1, %v801_v0  ;;  %v820_v5 = vld [vmem:[%s965_s1 + $0x30] sm:$0xff] }
   0x3   :  { %v30_v6 = vld [vmem:[%s964_s0] sm:$0xff]  ;;  %v667_v7 = vpack.c.bf16 %v820_v5, %v811_v2 }
   0x4   :  { %596 = vmatprep.mubr.msk.f32.mxu0 %vm36_vm0, %v30_v6 }
   0x5   :  { %9 = vsyncpa [#allocation3], 0  ;;  %664 = vmatprep.subr.bf16.mxu0 %v663_v4  ;;  %v31_v8 = vld [vmem:[%s964_s0 + $0x8] sm:$0xff]  ;;  %v835_v9 = vld [vmem:[%s967_s3] ss:$0 sm:$0xff]  ;;  %s766_s29 = smov 96   ;;  %v727_v54 = vpack.i.bf16 %v820_v5, %v811_v2 }
   0x6   :  { %666 = vmatpush3.bf16.msra.mxu0 %v663_v4  ;;  %v767_v32 = vmov 0.0|0.0   ;;  %vm768_vm1 = vmmov 0   ;;  %v769_v33 = vmov 0.0   ;;  %s770_s0 = smov 32   ;;  %v21_v47 = vld [vmem:[%s967_s3 + $0x3] sm:$0x3] }
   0x7   :  { %668 = vmatprep.subr.bf16.mxu0 %v667_v7  ;;  %686 = vmatprep.subr.bf16.mxu1 %v767_v32  ;;  %vm158_vm2 = vcmask 130048   ;;  %s771_s6 = smov 64   ;;  %vm331_vm3 = vcmask 254976  }
   0x8   :  { %660 = vmatprep.mubr.msk.f32.mxu1 %vm768_vm1, %v769_v33 }
   0xa   :  { %670 = vmatpush3.bf16.msra.mxu0 %v667_v7 }
   0xb   :  { %671 = vmatprep.subr.bf16.mxu0 %v767_v32 }
   0xd   :  { %597 = vmatmul.mubr.msk.f32.vlgmr.msra.gmra.mrb[0].mxu0 %vm36_vm0, %v31_v8  ;;  %v26_v8 = vld [vmem:[%s965_s1 + $0x8] sm:$0xff] }
   0xe   :  { %603 = vmatprep.mubr.msk.f32.mxu0 %vm768_vm1, %v769_v33 }
  0xe0   :  { %v598_v10 = vpop.f32.mrb[0].mxu0 }
  0xe1   :  { %v115_v11 = vadd.f32 %v598_v10, %v835_v9  ;;  %v109_v12 = vpop.f32.mrb[1].mxu0  ;;  %v27_v10 = vld [vmem:[%s965_s1 + $0x18] sm:$0xff] }
  0xe2   :  { %v110_v13 = vadd.f32 %v835_v9, %v109_v12  ;;  %v681_v12 = vpack.c.bf16 %v27_v10, %v26_v8 }
  0xe3   :  { %v128_v14 = vsel %vm36_vm0, %v115_v11, -inf }
  0xe4   :  { %v129_v15 = vrot.slane %v128_v14, 4  ;;  %v118_v16 = vsel %vm36_vm0, %v110_v13, -inf  ;;  %140 = vrot.lane.b32.xlu0 %v110_v13, %s766_s29 }
  0xe5   :  { %v119_v17 = vrot.slane %v118_v16, 4 }
  0xe6   :  { %v130_v18 = vmax.f32 %v128_v14, %v129_v15  ;;  %v439_v15 = vld [vmem:[%s966_s2] sm:$0xff] }
  0xe7   :  { %v120_v19 = vmax.f32 %v118_v16, %v119_v17  ;;  %v440_v16 = vld [vmem:[%s966_s2 + $0x8] sm:$0xff]  ;;  %v441_v17 = vld [vmem:[%s966_s2 + $0x10] sm:$0xff] }
  0xe8   :  { %v131_v20 = vrot.slane %v130_v18, 2  ;;  %142 = vrot.lane.b32.xlu0 %v115_v11, %s766_s29 }
  0xe9   :  { %v121_v21 = vrot.slane %v120_v19, 2 }
  0xea   :  { %v132_v22 = vmax.f32 %v130_v18, %v131_v20  ;;  %v687_v18 = vpack.c.bf16 %v440_v16, %v439_v15 }
  0xeb   :  { %v122_v23 = vmax.f32 %v120_v19, %v121_v21  ;;  %v442_v19 = vld [vmem:[%s966_s2 + $0x18] sm:$0xff]  ;;  %v443_v21 = vld [vmem:[%s966_s2 + $0x20] sm:$0xff] }
  0xec   :  { %v133_v24 = vrot.slane %v132_v22, 1  ;;  %723 = vrot.lane.b32.xlu0 %v722_v3, %s771_s6  ;;  %688 = vmatpush3.bf16.msra.mxu1 %v687_v18  ;;  %v690_v20 = vpack.c.bf16 %v442_v19, %v441_v17 }
  0xed   :  { %v123_v25 = vrot.slane %v122_v23, 1  ;;  %689 = vmatprep.subr.bf16.mxu1 %v767_v32 }
  0xee   :  { %v134_v26 = vmax.f32 %v132_v22, %v133_v24  ;;  %v444_v22 = vld [vmem:[%s966_s2 + $0x28] sm:$0xff] }
  0xef   :  { %v124_v27 = vmax.f32 %v122_v23, %v123_v25  ;;  %v693_v23 = vpack.c.bf16 %v444_v22, %v443_v21 }
  0xf0   :  { %v135_v28 = vsub.f32 %v115_v11, %v134_v26  ;;  %255 = vrot.lane.b32.xlu0 %v835_v9, %s771_s6  ;;  %v549_v11 = vld [vmem:[%s967_s3 + $0x1] ss:$0 sm:$0xff]  ;;  %691 = vmatpush3.bf16.msra.mxu1 %v690_v20 }
  0xf1   :  { %v125_v29 = vsub.f32 %v110_v13, %v124_v27  ;;  %v29_v13 = vld [vmem:[%s965_s1 + $0x38] sm:$0xff]  ;;  %692 = vmatprep.subr.bf16.mxu1 %v767_v32 }
  0xf2   :  { %v136_v30 = vmul.f32 1.442695, %v135_v28 }
  0xf3   :  { %v126_v31 = vmul.f32 1.442695, %v125_v29 }
  0xf4   :  { %732 = vpow2.f32 %v136_v30  ;;  %694 = vmatpush3.bf16.msra.mxu1 %v693_v23 }
  0xf5   :  { %734 = vpow2.f32 %v126_v31  ;;  %695 = vmatprep.subr.bf16.mxu1 %v767_v32 }
  0xfe   :  { %v733_v34 = vpop.eup %732 }
  0xff   :  { %v735_v35 = vpop.eup %734 }
 0x100   :  { %v717_v36 = vpack.i.bf16 %v733_v34, %v735_v35 }
 0x102   :  { %718 = vrot.lane.b32.xlu1 %v717_v36, %s770_s0  ;;  %v447_v36 = vld [vmem:[%s966_s2 + $0x40] sm:$0xff] }
 0x156   :  { %v141_v37 = vpop.permute.xlu0 %140 }
 0x157   :  { %v146_v40 = vmul.f32 %v735_v35, %v141_v37  ;;  %v448_v37 = vld [vmem:[%s966_s2 + $0x48] sm:$0xff] }
 0x15a   :  { %v143_v38 = vpop.permute.xlu0 %142 }
 0x15b   :  { %v147_v41 = vmul.f32 %v733_v34, %v143_v38  ;;  %v446_v34 = vld [vmem:[%s966_s2 + $0x38] sm:$0xff]  ;;  %v699_v38 = vpack.c.bf16 %v448_v37, %v447_v36 }
 0x15e   :  { %v724_v48 = vpop.permute.xlu0 %723 }
 0x15f   :  { %v726_v49 = vunpack.i.h.bf16 %v724_v48  ;;  %v725_v50 = vunpack.i.l.bf16 %v724_v48  ;;  %v550_v48 = vld [vmem:[%s967_s3 + $0x2] ss:$0 sm:$0xff] }
 0x161   :  { %v675_v51 = vpack.c.bf16 %v726_v49, %v725_v50 }
 0x162   :  { %v256_v62 = vpop.permute.xlu0 %255 }
 0x174   :  { %v719_v39 = vpop.permute.xlu1 %718 }
 0x175   :  { %v721_v42 = vunpack.i.h.bf16 %v719_v39  ;;  %v720_v43 = vunpack.i.l.bf16 %v719_v39  ;;  %v449_v39 = vld [vmem:[%s966_s2 + $0x50] sm:$0xff] }
 0x177   :  { %v157_v44 = vsel %vm36_vm0, %v147_v41, %v721_v42  ;;  %v156_v45 = vsel %vm36_vm0, %v146_v40, %v720_v43  ;;  %v450_v40 = vld [vmem:[%s966_s2 + $0x58] sm:$0xff]  ;;  %v451_v42 = vld [vmem:[%s966_s2 + $0x60] sm:$0xff]  ;;  %v452_v43 = vld [vmem:[%s966_s2 + $0x68] sm:$0xff] }
 0x178   :  { %v672_v46 = vpack.c.bf16 %v157_v44, %v156_v45  ;;  %v702_v41 = vpack.c.bf16 %v450_v40, %v449_v39  ;;  %v705_v44 = vpack.c.bf16 %v452_v43, %v451_v42  ;;  %v453_v45 = vld [vmem:[%s966_s2 + $0x70] sm:$0xff] }
 0x17a   :  { %673 = vmatpush3.bf16.msra.mxu0 %v672_v46  ;;  %v454_v46 = vld [vmem:[%s966_s2 + $0x78] sm:$0xff] }
 0x17b   :  { %674 = vmatprep.subr.bf16.mxu0 %v767_v32 }
 0x17d   :  { %604 = vmatmul.mubr.msk.f32.vlgmr.msra.gmra.mrb[2].mxu0 %vm158_vm2, %v21_v47  ;;  %v708_v47 = vpack.c.bf16 %v454_v46, %v453_v45 }
 0x17e   :  { %614 = vmatprep.mubr.msk.f32.mxu0 %vm768_vm1, %v769_v33  ;;  %676 = vmatpush3.bf16.msra.mxu0 %v675_v51 }
 0x17f   :  { %677 = vmatprep.subr.bf16.mxu0 %v767_v32 }
 0x250   :  { %v228_v52 = vpop.f32.mrb[2].mxu0 }
 0x251   :  { %233 = vrot.lane.b32.xlu1 %v228_v52, %s766_s29  ;;  %v605_v53 = vpop.f32.mrb[3].mxu0 }
 0x255   :  { %728 = vrot.lane.b32.xlu1 %v727_v54, %s771_s6 }
 0x2c3   :  { %v234_v55 = vpop.permute.xlu1 %233 }
 0x2c4   :  { %736 = vrcp.f32 %v234_v55 }
 0x2c7   :  { %v729_v56 = vpop.permute.xlu1 %728 }
 0x2c8   :  { %v731_v57 = vunpack.i.h.bf16 %v729_v56  ;;  %v730_v58 = vunpack.i.l.bf16 %v729_v56 }
 0x2ca   :  { %v678_v59 = vpack.c.bf16 %v731_v57, %v730_v58 }
 0x2cc   :  { %679 = vmatpush3.bf16.msra.mxu0 %v678_v59 }
 0x2cd   :  { %680 = vmatprep.subr.bf16.mxu0 %v767_v32 }
 0x2ce   :  { %v737_v60 = vpop.eup %736 }
 0x2cf   :  { %v237_v61 = vmul.f32 %v737_v60, %v228_v52 }
 0x2d1   :  { %615 = vmatmul.mubr.msk.f32.vlgmr.msra.gmra.mrb[4].mxu0 %vm36_vm0, %v237_v61 }
 0x2d2   :  { %625 = vmatprep.mubr.msk.f32.mxu0 %vm768_vm1, %v769_v33  ;;  %682 = vmatpush3.bf16.msra.mxu0 %v681_v12  ;;  %v445_v33 = vld [vmem:[%s966_s2 + $0x30] sm:$0xff] }
 0x2d3   :  { %683 = vmatprep.subr.bf16.mxu0 %v767_v32  ;;  %v696_v35 = vpack.c.bf16 %v446_v34, %v445_v33 }
 0x2d5   :  { %697 = vmatpush3.bf16.msra.mxu1 %v696_v35 }
 0x2d6   :  { %698 = vmatprep.subr.bf16.mxu1 %v767_v32 }
 0x2d9   :  { %700 = vmatpush3.bf16.msra.mxu1 %v699_v38 }
 0x2da   :  { %701 = vmatprep.subr.bf16.mxu1 %v767_v32 }
 0x2dd   :  { %703 = vmatpush3.bf16.msra.mxu1 %v702_v41 }
 0x2de   :  { %704 = vmatprep.subr.bf16.mxu1 %v767_v32 }
 0x2e1   :  { %706 = vmatpush3.bf16.msra.mxu1 %v705_v44 }
 0x2e2   :  { %707 = vmatprep.subr.bf16.mxu1 %v767_v32 }
 0x2e5   :  { %709 = vmatpush3.bf16.msra.mxu1 %v708_v47 }
 0x3a4   :  { %v327_v63 = vpop.f32.mrb[4].mxu0 }
 0x3a5   :  { %v866_v0 = vadd.f32 %v327_v63, %v256_v62  ;;  %v616_v1 = vpop.f32.mrb[5].mxu0 }
 0x3a7   :  { %v332_v2 = vsel %vm331_vm3, %v866_v0, 0.0 }
 0x3a8   :  { %333 = vadd.xlane.f32.xlu1 %v332_v2 }
 0x3b9   :  { %455 = vrot.lane.b32.xlu1 %v835_v9, %s770_s0  ;;  %v28_v9 = vld [vmem:[%s965_s1 + $0x28] sm:$0xff]  ;;  %s772_s1 = smov [#allocation2]  }
 0x3ba   :  { %v684_v14 = vpack.c.bf16 %v29_v13, %v28_v9  ;;  %s536_s2 = sshll.u32 %s772_s1, 4  ;;  %s537_s2 = int_to_ptr.vmem [resolvable:$true] %s536_s2 }
 0x3bb   :  { %s742_s3 = scalar_lea.vmem %s537_s2, 32  ;;  %p747_p1 = scmp.lt.s32.totalorder %s537_s2, %s537_s2 }
 0x3bc   :  { %685 = vmatpush3.bf16.msra.mxu0 %v684_v14  ;;  %p743_p0 = scmp.ne.s32.totalorder %s537_s2, %s742_s3  ;;  %p748_p2 = scmp.lt.s32.totalorder %s742_s3, %s742_s3 }
 0x3be   :  { %p749_p3 = por %p748_p2, %p747_p1 }
 0x3c0   :  { %p750_p4 = pnand %p749_p3, %p743_p0 }
 0x435   :  { %v334_v3 = vpop.xlane.xlu1 %333 }
 0x436   :  { %v336_v4 = vmul.f32 0.03125, %v334_v3 }
 0x438   :  { %v337_v5 = vsub.f32 %v866_v0, %v336_v4 }
 0x439   :  { %v456_v56 = vpop.permute.xlu1 %455 }
 0x43a   :  { %v338_v6 = vmul.f32 %v337_v5, %v337_v5 }
 0x43c   :  { %v339_v7 = vsel %vm331_vm3, %v338_v6, 0.0 }
 0x43d   :  { %340 = vadd.xlane.f32.xlu0 %v339_v7 }
 0x453   :  { %352 = vrot.lane.b32.xlu0 %v549_v11, %s766_s29 }
 0x4ca   :  { %v341_v24 = vpop.xlane.xlu0 %340 }
 0x4cb   :  { %v342_v25 = vmul.f32 0.03125, %v341_v24 }
 0x4cd   :  { %v343_v26 = vadd.f32 1e-05, %v342_v25 }
 0x4ce   :  { %v353_v29 = vpop.permute.xlu0 %352 }
 0x4cf   :  { %738 = vrsqrt.f32 %v343_v26 }
 0x4d9   :  { %v739_v27 = vpop.eup %738 }
 0x4da   :  { %v345_v28 = vmul.f32 %v739_v27, %v337_v5 }
 0x4dc   :  { %v350_v30 = vmul.f32 %v549_v11, %v345_v28 }
 0x4de   :  { %v355_v31 = vadd.f32 %v353_v29, %v350_v30 }
 0x4e0   :  { %626 = vmatmul.mubr.msk.f32.vlgmr.msra.gmra.mrb[6].mxu0 %vm36_vm0, %v355_v31 }
 0x5b3   :  { %v429_v49 = vpop.f32.mrb[6].mxu0 }
 0x5b4   :  { %v430_v50 = vadd.f32 %v550_v48, %v429_v49  ;;  %v627_v51 = vpop.f32.mrb[7].mxu0 }
 0x5b6   :  { %v435_v52 = vmul.f32 0.70710677, %v430_v50  ;;  %v433_v53 = vmul.f32 0.5, %v430_v50 }
 0x5b8   :  { %740 = verf.f32 %v435_v52 }
 0x5c2   :  { %v741_v32 = vpop.eup %740 }
 0x5c3   :  { %v437_v54 = vadd.f32 1.0, %v741_v32 }
 0x5c5   :  { %v438_v55 = vmul.f32 %v437_v54, %v433_v53 }
 0x5c7   :  { %661 = vmatmul.mubr.f32.vlgmr.msra.gmra.mrb[0].mxu1 %v438_v55 }
 0x69a   :  { %v524_v57 = vpop.f32.mrb[0].mxu1 }
 0x69b   :  { %v525_v58 = vadd.f32 %v524_v57, %v456_v56  ;;  %v662_v59 = vpop.f32.mrb[1].mxu1 }
 0x69d   :  { %v528_v60 = vadd.f32 %v525_v58, %v866_v0 }
 0x69f   :  { %529 = vst.msk [vmem:[#allocation2] sm:$0x3] %vm331_vm3, %v528_v60 }
 0x6a0   :  { %753 = shalt.err (!%p750_p4)
}
 0x6a1   :  { %s754_s25 = scalar_lea.hbm %s968_s4, 32 }
 0x6a2   :  { %p755_p5 = scmp.ne.s32.totalorder %s968_s4, %s754_s25  ;;  %p758_p6 = scmp.lt.u32.totalorder %s754_s25, %s968_s4 }
 0x6a4   :  { %p760_p7 = pnand %p758_p6, %p755_p5 }
 0x6a6   :  { %763 = shalt.err (!%p760_p7)
}
 0x6a7   :  { %539 = dma.vmem_to_hbm [thread:$0]  %s537_s2, 32, %s968_s4, [#allocation3]  }
 0x6a8   :  { %764 = dma.done.wait [#allocation3], 32  }
 0x6a9   :  { %765 = vsyncadd [#allocation3], 4294967264 }
 0x6aa   :  { %543 = vsyncpa [#allocation3], 1 }

</bundles_post_ra>
